<compile_context>
chip_gen: v7x
topology: tpu7x:2x2x1
jax: 0.10.0
libtpu: 0.0.40
codegen_flags: <defaults>
</compile_context>

<pallas_src>
import jax
import jax.numpy as jnp
from jax.experimental import pallas as pl
from jax.experimental.pallas import tpu as pltpu


def _clone_dma_kernel(src_ref, dst_ref, sem):
    # The `tensor.clone()` hot path: one HBM->HBM DMA of the whole state.
    cp = pltpu.make_async_copy(src_ref, dst_ref, sem)
    cp.start()
    cp.wait()


def fsm_state_clone(state):
    """Pallas implementation of the `tensor.clone()` performed inside forward().

    state: (B, S, C) FSM state (CBTensor, channel-last), any dtype/shape.
    returns a fresh buffer with identical contents.

    Implemented as a single HBM->HBM async copy (no VMEM staging, no grid),
    which saturates HBM bandwidth on v5e / v6e / v7x and has no tiling,
    lane-width, or scoped-VMEM constraints.
    """
    return pl.pallas_call(
        _clone_dma_kernel,
        out_shape=jax.ShapeDtypeStruct(state.shape, state.dtype),
        in_specs=[pl.BlockSpec(memory_space=pl.ANY)],
        out_specs=pl.BlockSpec(memory_space=pl.ANY),
        scratch_shapes=[pltpu.SemaphoreType.DMA(())],
    )(state)


def output_machine_forward(state, operation, prediction):
    """OutputMachine.forward:

    state:      (B, S, C) int32  -- FSM state (CBTensor)
    operation:  (B, S)    int32  -- selected operator index (unused for output)
    prediction: (B, S)    int32  -- predicted content (unused for output)
    returns:    (B, S, C) int32  -- the original `state` (module returns `tensor`)

    The action registry is empty, so forward applies no actions and returns the
    unmodified input.  No kernel launch, no HBM traffic (the internal clone's
    result is dead work in the PyTorch module; callers that need a distinct
    buffer can call `fsm_state_clone` explicitly).
    """
    del operation, prediction
    return state


if __name__ == "__main__":
    key = jax.random.PRNGKey(0)
    k_state, k_op, k_pred = jax.random.split(key, 3)

    B, S, C = 2, 8, 32          # batch, sequence, FSM channels
    num_operators = 4

    state = jax.random.randint(k_state, (B, S, C), minval=0, maxval=100,
                               dtype=jnp.int32)
    operation = jax.random.randint(k_op, (B, S), minval=0,
                                   maxval=num_operators, dtype=jnp.int32)
    prediction = jax.random.randint(k_pred, (B, S), minval=0, maxval=100,
                                    dtype=jnp.int32)

    # Run the Pallas clone kernel once (the module's internal `tensor.clone()`).
    cloned = fsm_state_clone(state)
    cloned = jax.block_until_ready(cloned)
    assert cloned.shape == state.shape
    assert cloned.dtype == state.dtype
    assert bool(jnp.all(cloned == state))

    # Full forward: identity passthrough of the original state.
    out = output_machine_forward(state, operation, prediction)
    out = jax.block_until_ready(out)
    assert out.shape == state.shape
    assert out.dtype == state.dtype
    assert bool(jnp.all(out == state))

    print("KERNEL_OK")
</pallas_src>

<mosaic_0001>
module attributes {stable_mosaic.version = 11 : i64} {
  func.func @_clone_dma_kernel(%arg0: memref<2x8x32xi32, #tpu.memory_space<any>>, %arg1: memref<2x8x32xi32, #tpu.memory_space<any>>, %arg2: memref<!tpu.dma_semaphore, #tpu.memory_space<semaphore_mem>>) attributes {dimension_semantics = [], scalar_prefetch = 0 : i64, scratch_operands = 1 : i64, tpu.core_type = #tpu.core_type<tc>} {
    tpu.enqueue_dma source(%arg0 : memref<2x8x32xi32, #tpu.memory_space<any>>) target(%arg1 : memref<2x8x32xi32, #tpu.memory_space<any>>) target_semaphore(%arg2 : memref<!tpu.dma_semaphore, #tpu.memory_space<semaphore_mem>>)
    tpu.wait_dma2 semaphore(%arg2 : memref<!tpu.dma_semaphore, #tpu.memory_space<semaphore_mem>>) src(%arg0 : memref<2x8x32xi32, #tpu.memory_space<any>>) dst(%arg1 : memref<2x8x32xi32, #tpu.memory_space<any>>)
    return
  }
}

</mosaic_0001>

<bundles_post_ra>
// kernel: tpu_custom_call.1
= control target key start
LH: loop header
LB: loop body
LE: loop exit
PB: predicated region body
PF: predicated region fallthrough
CT: control target
= control target key end

     0   :  { %s35_s6 = smov [#allocation2]   ;;  %s36_s7 = smov [#allocation3]   ;;  %s54_s0 = inlined_call_operand.hbm [shape: s32[2,8,32], index: 0, kind: input, shape index: {}]   ;;  %s55_s1 = inlined_call_operand.hbm [shape: s32[2,8,32], index: 1, kind: output, shape index: {}]  }
   0x1   :  { %s37_s8 = smov 0  }
   0x2   :  { %18 = dma.general %s54_s0, 256, %s55_s1, %s35_s6, %s36_s7, [#allocation4], %s37_s8, 0  }
   0x3   :  { %33 = dma.done.wait [#allocation2], 256 }
   0x4   :  { %34 = vsyncadd [#allocation2], 4294967040 }
   0x5   :  { %23 = vsyncmov [#allocation2] }
   0x8   :  { %s24_s13 = vpop.sfrf %23 }
   0x9   :  { %p29_p0 = scmp.ne.s32.totalorder %s24_s13, 0 }
   0xb   :  { %28 = shalt.err (%p29_p0)  }

</bundles_post_ra>
